<compile_context>
chip_gen: v7x
topology: tpu7x:2x2x1
jax: 0.10.0
libtpu: 0.0.40
codegen_flags: <defaults>
</compile_context>

<pallas_src>
import math

import numpy as np
import jax
import jax.numpy as jnp
from jax.experimental import pallas as pl
from jax.experimental.pallas import tpu as pltpu


def _aa_bilinear_weights(in_size: int, out_size: int, scale_factor: float) -> np.ndarray:
    """Separable antialiased bilinear resize weights, (out_size, in_size).

    Mirrors PyTorch's upsample_bilinear2d_aa (align_corners=False,
    antialias=True): triangle filter, support widened by 1/scale_factor when
    downscaling, weights normalized per output row.
    """
    if scale_factor is not None and scale_factor > 0:
        scale = 1.0 / float(scale_factor)        # PyTorch uses the provided scale_factor
    else:
        scale = in_size / out_size
    support = scale if scale > 1.0 else 1.0
    invscale = (1.0 / scale) if scale > 1.0 else 1.0

    W = np.zeros((out_size, in_size), dtype=np.float64)
    for i in range(out_size):
        center = scale * (i + 0.5)
        xmin = max(int(center - support + 0.5), 0)
        xmax = min(int(center + support + 0.5), in_size)
        ws = []
        for j in range(xmax - xmin):
            w = 1.0 - abs((j + xmin - center + 0.5) * invscale)
            ws.append(max(w, 0.0))
        total = sum(ws)
        if total > 0.0:
            for j, w in enumerate(ws):
                W[i, xmin + j] = w / total
    return W.astype(np.float32)


def _interp_kernel(x_ref, wht_ref, wwt_ref, o_ref):
    # x_ref:   (B, H_in, W_in)    block of B (n, c) image slices
    # wht_ref: (H_in, H_out)      row-resampling weights, pre-transposed (compute dtype)
    # wwt_ref: (W_in, W_out)      col-resampling weights, pre-transposed (compute dtype)
    # o_ref:   (B, H_out, W_out)
    B, H, W = x_ref.shape
    _, H_out, W_out = o_ref.shape
    cdt = wht_ref.dtype                                 # MXU compute dtype (bf16 default)

    # Height pass: ONE big 2-D MXU matmul, M = B*W, K = H, N = H_out.
    x = x_ref[...].astype(cdt)                          # (B, H, W)
    xt = jnp.swapaxes(x, 1, 2)                          # (B, W, H)   XLU transpose
    u = jnp.dot(xt.reshape(B * W, H), wht_ref[...],
                preferred_element_type=jnp.float32)     # (B*W, H_out) f32 accumulate

    # Width pass: ONE big 2-D MXU matmul, M = B*H_out, K = W, N = W_out.
    u3 = u.reshape(B, W, H_out).astype(cdt)             # (B, W, H_out)
    ut = jnp.swapaxes(u3, 1, 2)                         # (B, H_out, W)  XLU transpose
    out = jnp.dot(ut.reshape(B * H_out, W), wwt_ref[...],
                  preferred_element_type=jnp.float32)   # (B*H_out, W_out) f32 accumulate

    o_ref[...] = out.reshape(B, H_out, W_out).astype(o_ref.dtype)


def _round_up(x: int, m: int) -> int:
    return ((x + m - 1) // m) * m


def _tile_bytes(rows: int, cols: int, itemsize: int) -> int:
    """VMEM footprint of a (rows, cols) slab including (8,128) tile padding
    (sublane packing widens to 16/32 rows for 16-/8-bit dtypes)."""
    sub = 8 * max(1, 4 // itemsize)
    return _round_up(max(rows, 1), sub) * _round_up(max(cols, 1), 128) * itemsize


def _vmem_capacity_bytes() -> int:
    try:
        cap = getattr(pltpu.get_tpu_info(), "vmem_capacity_bytes", None)
        if cap:
            return int(cap)
    except Exception:
        pass
    return 64 * 1024 * 1024          # conservative default: v7x per-TensorCore VMEM


def _plan_blocks(nc, h, w, h_out, w_out, in_itemsize, cd_itemsize, block_batch):
    """Chip-aware choice of (images per block B, grid size G, vmem limit)."""
    cap = _vmem_capacity_bytes()
    budget = (cap * 2) // 5          # ~51 MiB on 128 MiB chips, ~25 MiB on v7x
    vmem_limit = (cap * 3) // 4      # 96 MiB on v5e/v6e, 48 MiB on v7x
    f32 = 4

    # Double-buffered, VMEM-resident weight matrices come out of the budget.
    weights = 2 * (_tile_bytes(h, h_out, cd_itemsize) + _tile_bytes(w, w_out, cd_itemsize))

    # Per-image working set, with (8,128) tile padding (double-buffered I/O
    # blocks plus the in-kernel cast / transpose / f32-accumulate temporaries).
    per_img = (
        2 * _tile_bytes(h, w, in_itemsize)
        + 2 * _tile_bytes(h_out, w_out, in_itemsize)
        + _tile_bytes(h, w, cd_itemsize)
        + _tile_bytes(w, h, cd_itemsize)
        + _tile_bytes(w, h_out, f32)
        + _tile_bytes(w, h_out, cd_itemsize)
        + _tile_bytes(h_out, w, cd_itemsize)
        + _tile_bytes(h_out, w_out, f32)
    )

    if block_batch is not None:
        b = int(max(1, min(block_batch, nc)))
        g = -(-nc // b)
        return b, g, int(vmem_limit)

    usable = max(budget - weights - (1 << 20), per_img)
    b = int(max(1, min(usable // per_img, nc)))
    # TODO(synk): a single huge image (per_img > budget) additionally needs a
    # spatial (H_out / W_out) tiling grid axis.

    g = -(-nc // b)
    if nc >= 2:
        g = max(g, 2)                # >= 2 grid steps: both v7x TensorCores get work
    b = -(-nc // g)                  # re-balance; also minimizes batch padding
    g = -(-nc // b)
    return b, g, int(vmem_limit)


def interpolation_pallas(rgb: jax.Array, sr_ratio: float = 1, block_batch=None,
                         mxu_dtype=jnp.bfloat16) -> jax.Array:
    """Bilinear (antialiased, align_corners=False) resize of an NCHW tensor."""
    N, C, H, W = rgb.shape
    H_out = int(math.floor(H * sr_ratio))
    W_out = int(math.floor(W * sr_ratio))

    if not jnp.issubdtype(rgb.dtype, jnp.floating):
        rgb = rgb.astype(jnp.float32)   # PyTorch's antialiased interpolate is float-only
    out_dtype = rgb.dtype

    # Pre-transposed weights in the MXU compute dtype (built once on the host).
    wht = jnp.asarray(np.ascontiguousarray(_aa_bilinear_weights(H, H_out, sr_ratio).T),
                      dtype=mxu_dtype)                                  # (H, H_out)
    wwt = jnp.asarray(np.ascontiguousarray(_aa_bilinear_weights(W, W_out, sr_ratio).T),
                      dtype=mxu_dtype)                                  # (W, W_out)

    NC = N * C
    x = rgb.reshape(NC, H, W)

    in_it = jnp.dtype(rgb.dtype).itemsize
    cd_it = jnp.dtype(mxu_dtype).itemsize
    B, G, vmem_limit = _plan_blocks(NC, H, W, H_out, W_out, in_it, cd_it, block_batch)

    NC_pad = G * B
    if NC_pad != NC:
        x = jnp.pad(x, ((0, NC_pad - NC), (0, 0), (0, 0)))

    flops = 2 * NC_pad * (W * H * H_out + H_out * W * W_out)
    bytes_accessed = (NC_pad * (H * W + H_out * W_out)) * in_it \
                     + (H * H_out + W * W_out) * cd_it
    cost = pl.CostEstimate(flops=flops, transcendentals=0, bytes_accessed=bytes_accessed)

    out = pl.pallas_call(
        _interp_kernel,
        out_shape=jax.ShapeDtypeStruct((NC_pad, H_out, W_out), out_dtype),
        grid_spec=pltpu.PrefetchScalarGridSpec(
            num_scalar_prefetch=0,
            grid=(G,),
            in_specs=[
                pl.BlockSpec((B, H, W), lambda i: (i, 0, 0)),
                pl.BlockSpec((H, H_out), lambda i: (0, 0)),   # stays VMEM-resident
                pl.BlockSpec((W, W_out), lambda i: (0, 0)),   # stays VMEM-resident
            ],
            out_specs=pl.BlockSpec((B, H_out, W_out), lambda i: (i, 0, 0)),
        ),
        compiler_params=pltpu.CompilerParams(
            dimension_semantics=("parallel",),     # shardable over v7x's 2 TensorCores
            vmem_limit_bytes=vmem_limit,           # chip-aware scoped VMEM limit
        ),
        cost_estimate=cost,
    )(x, wht, wwt)

    return out[:NC].reshape(N, C, H_out, W_out)


if __name__ == "__main__":
    key = jax.random.PRNGKey(0)
    x = jax.random.normal(key, (2, 4, 16, 16), dtype=jnp.float32)

    # sr_ratio = 1 (module default): antialiased bilinear resize at scale 1 is
    # the identity (weights are exact even in bf16; only error is bf16 rounding).
    y1 = interpolation_pallas(x, sr_ratio=1)
    jax.block_until_ready(y1)
    assert y1.shape == (2, 4, 16, 16)
    assert np.allclose(np.asarray(y1), np.asarray(x), atol=5e-2)

    # sr_ratio = 2: genuine upsampling (16x16 -> 32x32); compare against a
    # plain-numpy separable reference. Default (bf16 MXU) path: loose tol.
    wh_ref = _aa_bilinear_weights(16, 32, 2)
    ww_ref = _aa_bilinear_weights(16, 32, 2)
    ref2 = np.einsum('oh,nchw,vw->ncov', wh_ref, np.asarray(x), ww_ref)

    y2 = interpolation_pallas(x, sr_ratio=2)
    jax.block_until_ready(y2)
    assert y2.shape == (2, 4, 32, 32)
    assert np.allclose(np.asarray(y2), ref2, atol=1e-1)

    # Force a multi-step grid with batch padding (NC=8, B=3 -> grid=3, pad to 9)
    # to exercise the blocked/padded path.
    y3 = interpolation_pallas(x, sr_ratio=2, block_batch=3)
    jax.block_until_ready(y3)
    assert np.allclose(np.asarray(y3), ref2, atol=1e-1)

    # Full-precision MXU path: tight match against the reference.
    y4 = interpolation_pallas(x, sr_ratio=2, mxu_dtype=jnp.float32)
    jax.block_until_ready(y4)
    assert np.allclose(np.asarray(y4), ref2, atol=1e-4)

    print("KERNEL_OK")
</pallas_src>

<mosaic_0001>
module attributes {stable_mosaic.version = 11 : i64} {
  func.func @_interp_kernel(%arg0: i32, %arg1: memref<4x16x16xf32, #tpu.memory_space<vmem>>, %arg2: memref<16x16xbf16, #tpu.memory_space<vmem>>, %arg3: memref<16x16xbf16, #tpu.memory_space<vmem>>, %arg4: memref<4x16x16xf32, #tpu.memory_space<vmem>>) attributes {dimension_semantics = [#tpu.dimension_semantics<parallel>], iteration_bounds = array<i64: 2>, scalar_prefetch = 0 : i64, scratch_operands = 0 : i64, tpu.core_type = #tpu.core_type<tc>, window_params = [{transform_indices = @transform_0, window_bounds = array<i64: 4, 16, 16>}, {pipeline_mode = #tpu.pipeline_mode<synchronous>, transform_indices = @transform_1, window_bounds = array<i64: 16, 16>}, {pipeline_mode = #tpu.pipeline_mode<synchronous>, transform_indices = @transform_2, window_bounds = array<i64: 16, 16>}, {transform_indices = @transform_3, window_bounds = array<i64: 4, 16, 16>}]} {
    %c0 = arith.constant 0 : index
    %c0_0 = arith.constant 0 : index
    %c0_1 = arith.constant 0 : index
    %0 = vector.load %arg1[%c0, %c0_0, %c0_1] : memref<4x16x16xf32, #tpu.memory_space<vmem>>, vector<4x16x16xf32>
    %1 = arith.truncf %0 : vector<4x16x16xf32> to vector<4x16x16xbf16>
    %2 = tpu.transpose %1, [0, 2, 1] : vector<4x16x16xbf16> -> vector<4x16x16xbf16>
    %3 = vector.shape_cast %2 : vector<4x16x16xbf16> to vector<64x16xbf16>
    %c0_2 = arith.constant 0 : index
    %c0_3 = arith.constant 0 : index
    %4 = vector.load %arg2[%c0_2, %c0_3] : memref<16x16xbf16, #tpu.memory_space<vmem>>, vector<16x16xbf16>
    %cst = arith.constant dense<0.000000e+00> : vector<64x16xf32>
    %5 = tpu.matmul %3, %4, %cst {dimension_numbers = #tpu.dot_dimension_numbers<[1], [0], [0], [1], [0, 0, 1, 1], [], []>} : vector<64x16xbf16>, vector<16x16xbf16>, vector<64x16xf32> -> vector<64x16xf32>
    %6 = vector.shape_cast %5 : vector<64x16xf32> to vector<4x16x16xf32>
    %7 = arith.truncf %6 : vector<4x16x16xf32> to vector<4x16x16xbf16>
    %8 = tpu.transpose %7, [0, 2, 1] : vector<4x16x16xbf16> -> vector<4x16x16xbf16>
    %9 = vector.shape_cast %8 : vector<4x16x16xbf16> to vector<64x16xbf16>
    %c0_4 = arith.constant 0 : index
    %c0_5 = arith.constant 0 : index
    %10 = vector.load %arg3[%c0_4, %c0_5] : memref<16x16xbf16, #tpu.memory_space<vmem>>, vector<16x16xbf16>
    %cst_6 = arith.constant dense<0.000000e+00> : vector<64x16xf32>
    %11 = tpu.matmul %9, %10, %cst_6 {dimension_numbers = #tpu.dot_dimension_numbers<[1], [0], [0], [1], [0, 0, 1, 1], [], []>} : vector<64x16xbf16>, vector<16x16xbf16>, vector<64x16xf32> -> vector<64x16xf32>
    %12 = vector.shape_cast %11 : vector<64x16xf32> to vector<4x16x16xf32>
    %c0_7 = arith.constant 0 : index
    %c0_8 = arith.constant 0 : index
    %c0_9 = arith.constant 0 : index
    %13 = vector.load %arg4[%c0_7, %c0_8, %c0_9] : memref<4x16x16xf32, #tpu.memory_space<vmem>>, vector<4x16x16xf32>
    tpu.vector_store %arg4[%c0_7, %c0_8, %c0_9], %12 {strides = array<i32>} : memref<4x16x16xf32, #tpu.memory_space<vmem>>, vector<4x16x16xf32>,
    return
  }
  func.func @transform_0(%arg0: i32) -> (i32, i32, i32) {
    %c0_i32 = arith.constant 0 : i32
    %c0_i32_0 = arith.constant 0 : i32
    %c0_i32_1 = arith.constant 0 : i32
    return %arg0, %c0_i32, %c0_i32_0 : i32, i32, i32
  }
  func.func @transform_1(%arg0: i32) -> (i32, i32) {
    %c0_i32 = arith.constant 0 : i32
    %c0_i32_0 = arith.constant 0 : i32
    %c0_i32_1 = arith.constant 0 : i32
    return %c0_i32, %c0_i32_0 : i32, i32
  }
  func.func @transform_2(%arg0: i32) -> (i32, i32) {
    %c0_i32 = arith.constant 0 : i32
    %c0_i32_0 = arith.constant 0 : i32
    %c0_i32_1 = arith.constant 0 : i32
    return %c0_i32, %c0_i32_0 : i32, i32
  }
  func.func @transform_3(%arg0: i32) -> (i32, i32, i32) {
    %c0_i32 = arith.constant 0 : i32
    %c0_i32_0 = arith.constant 0 : i32
    %c0_i32_1 = arith.constant 0 : i32
    return %arg0, %c0_i32, %c0_i32_0 : i32, i32, i32
  }
}

</mosaic_0001>

<bundles_post_ra>
// kernel: tpu_custom_call.1
= control target key start
LH: loop header
LB: loop body
LE: loop exit
PB: predicated region body
PF: predicated region fallthrough
CT: control target
= control target key end

     0   :  { %8 = vsyncpa [#allocation3], 0  ;;  %s1234_s0 = inlined_call_operand.hbm [shape: f32[8,16,16], index: 0, kind: input, shape index: {}]   ;;  %s1235_s1 = inlined_call_operand.hbm [shape: bf16[16,16], index: 1, kind: input, shape index: {}]   ;;  %s1236_s2 = inlined_call_operand.hbm [shape: bf16[16,16], index: 2, kind: input, shape index: {}]   ;;  %s1237_s3 = inlined_call_operand.hbm [shape: f32[8,16,16], index: 3, kind: output, shape index: {}]  }
   0x1   :  { %10 = vsyncpa [#allocation3 + $0x1], 0 }
   0x2   :  { %11 = vsyncpa [#allocation6], 0 }
   0x3   :  { %12 = vsyncpa [#allocation4], 0 }
   0x4   :  { %14 = vsyncpa [#allocation4 + $0x1], 0  ;;  %s980_s12 = smov 0   ;;  %s982_s13 = smov 0  }
   0x5   :  { %s984_s14 = smov 0   ;;  %s986_s15 = smov 0  }
   0x6 LB: > { %s1001_s16 = sadd.s32 4294967295, %s948_s15   ;;  %s652_s17 = sadd.s32 4294967294, %s948_s15   ;;  %s948_s15 = sphi %s986_s15, %s1257_s15   ;;  %s944_s14 = sphi %s984_s14, %s1256_s14   ;;  %s940_s13 = sphi %s982_s13, %s1255_s13   ;;  %s936_s12 = sphi %s980_s12, %s1254_s12  }
   0x7   : > { %p40_p0 = scmp.ne.s32.totalorder %s940_s13, %s936_s12  ;;  %p1238_p1 = scmp.eq.s32.totalorder %s1001_s16, 0 }
   0x8   : > { %p112_p3 = scmp.eq.s32.totalorder %s652_s17, 1  ;;  %p653_p5 = scmp.ge.s32.totalorder %s948_s15, 1 }
   0x9   : > { %p1010_p4 = por %p1238_p1, %p40_p0  ;;  %p119_p7 = scmp.lt.s32.totalorder %s948_s15, 3 }
   0xa   : > { %p1015_p6 = por %p112_p3, %p40_p0  ;;  %s950_s21 = smov [#allocation5]  }
   0xb   : > { %s1241_s18 = scalar_select %p1010_p4, 1, 0 }
   0xc   : > { %s1242_s19 = scalar_select %p1015_p6, 1, 0 }
   0xd   : > { %p1020_p8 = pnand %p653_p5, %p119_p7  ;;  %s131_s22 = sshll.u32 %s950_s21, 4  ;;  %s1024_s22 = int_to_ptr.vmem [resolvable:$true] %s131_s22 }
   0xe   : > { %s951_s24 = smov [#allocation7]   ;;  %s792_s28 = scalar_lea.hbm %s1235_s1, 128 }
   0xf   : > { %p728_p9 = pneg %p1020_p8  ;;  %s144_s25 = sshll.u32 %s951_s24, 4  ;;  %s1035_s25 = int_to_ptr.vmem [resolvable:$true] %s144_s25 }
  0x10   : > { %p793_p12 = scmp.ne.s32.totalorder %s1235_s1, %s792_s28  ;;  %p799_p5 = scmp.lt.u32.totalorder %s792_s28, %s1235_s1 }
  0x11   : > { %p1031_p11 = pnand %p728_p9, %p1238_p1 }
  0x13   : > { %p794_p13 = pneg %p1031_p11 }
  0x15   : > { %p795_p0 = pnand %p794_p13, %p793_p12 }
  0x17   : > { %p796_p3 = pneg %p795_p0 }
  0x19   : > { %p801_p7 = pnand %p799_p5, %p796_p3 }
  0x1b   : > { %804 = shalt.err (!%p801_p7)
}
  0x1c   : > { %s805_s6 = scalar_lea.vmem %s1024_s22, 128  ;;  %p813_p2 = scmp.lt.s32.totalorder %s1024_s22, %s1024_s22 }
  0x1d   : > { %p806_p9 = scmp.ne.s32.totalorder %s1024_s22, %s805_s6  ;;  %p814_p12 = scmp.lt.s32.totalorder %s805_s6, %s805_s6 }
  0x1f   : > { %p808_p10 = pnand %p806_p9, %p794_p13  ;;  %p815_p0 = por %p814_p12, %p813_p2 }
  0x21   : > { %p809_p1 = pneg %p808_p10 }
  0x23   : > { %p816_p6 = pnand %p815_p0, %p809_p1 }
  0x25   : > { %819 = shalt.err (!%p816_p6)
}
  0x26   : > { %s952_s7 = smov 64   ;;  %s953_s8 = smov 4  }
  0x27   : > { %731 = dma.hbm_to_vmem [thread:$0]  (!%p1031_p11), %s1235_s1, 128, %s1024_s22, [#allocation6], %s952_s7, %s952_s7, %s953_s8  }
  0x28   : > { %s820_s21 = scalar_lea.hbm %s1236_s2, 128 }
  0x29   : > { %p821_p2 = scmp.ne.s32.totalorder %s1236_s2, %s820_s21  ;;  %p827_p10 = scmp.lt.u32.totalorder %s820_s21, %s1236_s2 }
  0x2b   : > { %p823_p1 = pnand %p821_p2, %p794_p13 }
  0x2d   : > { %p824_p6 = pneg %p823_p1 }
  0x2f   : > { %p829_p3 = pnand %p827_p10, %p824_p6 }
  0x31   : > { %832 = shalt.err (!%p829_p3)
}
  0x32   : > { %s833_s22 = scalar_lea.vmem %s1035_s25, 128  ;;  %p841_p12 = scmp.lt.s32.totalorder %s1035_s25, %s1035_s25 }
  0x33   : > { %p834_p5 = scmp.ne.s32.totalorder %s1035_s25, %s833_s22  ;;  %p842_p0 = scmp.lt.s32.totalorder %s833_s22, %s833_s22 }
  0x35   : > { %p836_p7 = pnand %p834_p5, %p794_p13  ;;  %p843_p2 = por %p842_p0, %p841_p12 }
  0x37   : > { %p837_p9 = pneg %p836_p7 }
  0x39   : > { %p844_p1 = pnand %p843_p2, %p837_p9 }
  0x3b   : > { %847 = shalt.err (!%p844_p1)
}
  0x3c   : > { %734 = dma.hbm_to_vmem [thread:$0]  (!%p1031_p11), %s1236_s2, 128, %s1035_s25, [#allocation6], %s952_s7, %s952_s7, %s953_s8  }
  0x3d   : > { %s1090_s4 = sadd.s32 1, %s948_s15   ;;  %s27_s23 = sadd.s32 1, %s944_s14 }
  0x3e   : > { %s24_s5 = ssub.s32 %s948_s15, %s1090_s4  ;;  %p34_p13 = scmp.ne.s32.totalorder %s944_s14, %s940_s13 }
  0x3f   : > { %p25_p6 = scmp.eq.s32.totalorder %s24_s5, 0  ;;  %p35_p10 = scmp.eq.s32.totalorder %s948_s15, 0 }
  0x40   : > { %p1245_p3 = scmp.eq.s32.totalorder %s1001_s16, 1  ;;  %p745_p7 = scmp.lt.s32.totalorder %s948_s15, 2 }
  0x41   : > { %s1106_s9 = scalar_select %p25_p6, %s944_s14, %s27_s23  }
  0x42   : > { %p1100_p5 = por %p1245_p3, %p34_p13  ;;  %p36_p9 = por %p35_p10, %p34_p13 }
  0x43   : > { %s158_s10 = sand.u32 1, %s944_s14   ;;  %s683_s25 = sshll.u32 %s948_s15, 10 }
  0x44   : > { %s1246_s6 = scalar_select %p1100_p5, 1, 0 }
  0x45   : > { %s657_s11 = sshll.u32 %s158_s10, 6  ;;  %s1113_s17 = scalar_lea.hbm %s1234_s0, %s683_s25 }
  0x46   : > { %s162_s21 = scalar_lea.vmem [#allocation2], %s657_s11  ;;  %p1117_p11 = pnand %p745_p7, %p36_p9 }
  0x47   : > { %s170_s24 = sshll.u32 %s162_s21, 4  ;;  %s1121_s27 = scalar_lea.sflag [#allocation3], %s158_s10  ;;  %s1115_s24 = int_to_ptr.vmem [resolvable:$true] %s170_s24 }
  0x48   : > { %s848_s28 = scalar_lea.hbm %s1113_s17, 1024  ;;  %p850_p0 = pneg %p1117_p11 }
  0x49   : > { %p849_p12 = scmp.ne.s32.totalorder %s1113_s17, %s848_s28  ;;  %s853_s30 = scalar_lea.hbm %s1234_s0, 2048 }
  0x4a   : > { %p854_p13 = scmp.lt.u32.totalorder %s1113_s17, %s1234_s0  ;;  %p855_p6 = scmp.lt.u32.totalorder %s853_s30, %s848_s28 }
  0x4b   : > { %p851_p2 = pnand %p850_p0, %p849_p12  ;;  %p857_p3 = scmp.lt.u32.totalorder %s848_s28, %s1113_s17 }
  0x4c   : > { %p856_p10 = por %p855_p6, %p854_p13 }
  0x4d   : > { %p852_p1 = pneg %p851_p2 }
  0x4e   : > { %p858_p7 = por %p857_p3, %p856_p10 }
  0x50   : > { %p859_p9 = pnand %p858_p7, %p852_p1 }
  0x52   : > { %862 = shalt.err (!%p859_p9)
}
  0x53   : > { %s863_s10 = scalar_lea.vmem %s1115_s24, 1024  ;;  %s954_s11 = smov [#allocation2]  }
  0x54   : > { %p864_p12 = scmp.ne.s32.totalorder %s1115_s24, %s863_s10  ;;  %s868_s25 = sshll.u32 %s954_s11, 4  ;;  %s869_s25 = int_to_ptr.vmem [resolvable:$false] %s868_s25 }
  0x55   : > { %s870_s7 = scalar_lea.vmem %s869_s25, 2048  ;;  %p871_p4 = scmp.lt.s32.totalorder %s1115_s24, %s869_s25 }
  0x56   : > { %p866_p2 = pnand %p864_p12, %p850_p0  ;;  %p872_p13 = scmp.lt.s32.totalorder %s870_s7, %s863_s10 }
  0x58   : > { %p867_p5 = pneg %p866_p2  ;;  %p873_p6 = por %p872_p13, %p871_p4 }
  0x5a   : > { %p874_p10 = pnand %p873_p6, %p867_p5 }
  0x5c   : > { %877 = shalt.err (!%p874_p10)
}
  0x5d   : > { %s955_s8 = smov 128   ;;  %s956_s21 = smov 8  }
  0x5e   : > { %738 = dma.hbm_to_vmem [thread:$0]  (!%p1117_p11), %s1113_s17, 1024, %s1115_s24, %s1121_s27, %s955_s8, %s955_s8, %s956_s21  }
  0x5f   : > { %182 = sbr.rel (%p1020_p8) target bundleno = 775 (0x307), region = 32  ;;  %s1152_s28 = sand.u32 (!%p1020_p8), 1, %s940_s13  }
  0x60   : > { %s662_s22 = sshll.u32 (!%p1020_p8), %s1152_s28, 6  ;;  %s185_s29 = scalar_lea.sflag (!%p1020_p8), [#allocation3], %s1152_s28 }
  0x61   : > { %s188_s30 = scalar_lea.vmem (!%p1020_p8), [#allocation2], %s662_s22  ;;  %p1248_p4 = scmp.ne.s32.totalorder (!%p1020_p8), %s1241_s18, 0 }
  0x66   : > { %923 = dma.done.wait (%p1248_p4), %s185_s29, 1024  }
  0x67   : > { %925 = vsyncadd (%p1248_p4), %s185_s29, 4294966272  ;;  %p1249_p5 = scmp.eq.s32.totalorder %s1001_s16, 0 }
  0x69   : > { %927 = dma.done.wait (%p1249_p5), [#allocation6], 256   ;;  %p1250_p8 = pmov %p1249_p5 }
  0x6a   : > { %v222_v0 = vld [vmem:[%s188_s30] sm:$0xff]  ;;  %v223_v1 = vld [vmem:[%s188_s30 + $0x8] sm:$0xff]  ;;  %v224_v2 = vld [vmem:[%s188_s30 + $0x10] sm:$0xff]  ;;  %vm306_vm0 = vcmask 130048   ;;  %s218_s18 = scalar_lea.vmem [#allocation8], %s662_s22  ;;  %s685_s17 = sshll.u32 %s1001_s16, 10 }
  0x6b   : > { %929 = vsyncadd (%p1250_p8), [#allocation6], 4294967040  ;;  %v230_v3 = vpack.c.bf16 %v223_v1, %v222_v0  ;;  %v225_v4 = vld [vmem:[%s188_s30 + $0x18] sm:$0xff]  ;;  %v226_v5 = vld [vmem:[%s188_s30 + $0x20] sm:$0xff]  ;;  %s560_s20 = sshll.u32 %s218_s18, 4  ;;  %s1187_s27 = scalar_lea.hbm %s1237_s3, %s685_s17  ;;  %s1181_s20 = int_to_ptr.vmem [resolvable:$true] %s560_s20 }
  0x6c   : > { %v227_v6 = vld [vmem:[%s188_s30 + $0x28] sm:$0xff]  ;;  %v228_v8 = vld [vmem:[%s188_s30 + $0x30] sm:$0xff]  ;;  %v229_v9 = vld [vmem:[%s188_s30 + $0x38] sm:$0xff]  ;;  %v231_v10 = vpack.c.bf16 %v225_v4, %v224_v2  ;;  %s546_s16 = scalar_lea.sflag [#allocation4], %s1152_s28  ;;  %s878_s23 = scalar_lea.vmem %s1181_s20, 1024 }
  0x6d   : > { %v232_v7 = vpack.c.bf16 %v227_v6, %v226_v5  ;;  %234 = vxpose.xlu0.c.b16.start.end [1/1] (short) (narrow) %v230_v3, 16  ;;  %v790_v11 = vld [vmem:[#allocation5] sm:$0xff]   ;;  %v233_v12 = vpack.c.bf16 %v229_v9, %v228_v8  ;;  %v791_v17 = vld [vmem:[#allocation7] sm:$0xff]   ;;  %p879_p11 = scmp.ne.s32.totalorder %s1181_s20, %s878_s23  ;;  %p1251_p0 = scmp.ne.s32.totalorder %s1246_s6, 0 }
  0x6e   : > { %696 = vmatprep.subr.bf16.mxu0 %v790_v11  ;;  %706 = vmatprep.subr.bf16.mxu1 %v791_v17  ;;  %s957_s5 = smov [#allocation8]  }
  0x6f   : > { %266 = vxpose.xlu1.c.b16.start.end [1/1] (short) (narrow) %v232_v7, 16  ;;  %697 = vmatpush3.bf16.msra.mxu0 %v790_v11  ;;  %p880_p1 = pnand %p879_p11, %p1251_p0  ;;  %s882_s10 = sshll.u32 %s957_s5, 4  ;;  %s883_s10 = int_to_ptr.vmem [resolvable:$false] %s882_s10 }
  0x70   : > { %707 = vmatpush3.bf16.msra.mxu1 %v791_v17  ;;  %s884_s11 = scalar_lea.vmem %s883_s10, 2048  ;;  %p885_p7 = scmp.lt.s32.totalorder %s1181_s20, %s883_s10 }
  0x71   : > { %250 = vxpose.xlu0.c.b16.start.end [1/1] (short) (narrow) %v231_v10, 16  ;;  %p881_p3 = pneg %p880_p1  ;;  %p886_p9 = scmp.lt.s32.totalorder %s884_s11, %s878_s23 }
  0x73   : > { %282 = vxpose.xlu1.c.b16.start.end [1/1] (short) (narrow) %v233_v12, 16  ;;  %p887_p12 = por %p886_p9, %p885_p7 }
  0x75   : > { %p888_p2 = pnand %p887_p12, %p881_p3 }
  0xd3   : > { %v242_v13 = vpop.trf.xlu0 }
  0xd4   : > { %698 = vmatprep.mubr.msk.bf16.mxu0 %vm306_vm0, %v242_v13 }
  0xd5   : > { %v274_v14 = vpop.trf.xlu1 }
  0xd7   : > { %v258_v15 = vpop.trf.xlu0 }
  0xd8   : > { %699 = vmatmul.mubr.msk.bf16.vlgmr.msra.gmra.mrb[0].mxu0 %vm306_vm0, %v258_v15 }
  0xd9   : > { %702 = vmatprep.mubr.msk.bf16.mxu0 %vm306_vm0, %v274_v14  ;;  %v290_v16 = vpop.trf.xlu1 }
  0xe0   : > { %703 = vmatmul.mubr.msk.bf16.gmra.mrb[4].mxu0 %vm306_vm0, %v290_v16 }
 0x1ab   : > { %v700_v18 = vpop.f32.mrb[0].mxu0 }
 0x1ac   : > { %v353_v19 = vpop.f32.mrb[1].mxu0 }
 0x1ad   : > { %v701_v20 = vpop.f32.mrb[2].mxu0 }
 0x1ae   : > { %v385_v21 = vpack.c.bf16 %v701_v20, %v700_v18  ;;  %v356_v22 = vpop.f32.mrb[3].mxu0 }
 0x1af   : > { %v384_v23 = vpack.c.bf16 %v356_v22, %v353_v19 }
 0x1b0   : > { %404 = vxpose.xlu1.c.b16.start.end [1/1] (short) (narrow) %v385_v21, 16 }
 0x1b1   : > { %388 = vxpose.xlu0.c.b16.start.end [1/1] (short) (narrow) %v384_v23, 16 }
 0x1b3   : > { %v704_v24 = vpop.f32.mrb[4].mxu0 }
 0x1b4   : > { %v369_v25 = vpop.f32.mrb[5].mxu0 }
 0x1b5   : > { %v705_v26 = vpop.f32.mrb[6].mxu0 }
 0x1b6   : > { %v387_v27 = vpack.c.bf16 %v705_v26, %v704_v24  ;;  %v372_v28 = vpop.f32.mrb[7].mxu0 }
 0x1b7   : > { %v386_v29 = vpack.c.bf16 %v372_v28, %v369_v25 }
 0x1b8   : > { %436 = vxpose.xlu1.c.b16.start.end [1/1] (short) (narrow) %v387_v27, 16 }
 0x1b9   : > { %420 = vxpose.xlu0.c.b16.start.end [1/1] (short) (narrow) %v386_v29, 16 }
 0x216   : > { %v412_v30 = vpop.trf.xlu1 }
 0x217   : > { %v396_v31 = vpop.trf.xlu0 }
 0x218   : > { %708 = vmatprep.mubr.msk.bf16.mxu1 %vm306_vm0, %v396_v31 }
 0x219   : > { %709 = vmatmul.mubr.msk.bf16.vlgmr.msra.gmra.mrb[0].mxu1 %vm306_vm0, %v412_v30 }
 0x21e   : > { %v444_v32 = vpop.trf.xlu1 }
 0x21f   : > { %v428_v33 = vpop.trf.xlu0 }
 0x220   : > { %712 = vmatprep.mubr.msk.bf16.mxu1 %vm306_vm0, %v428_v33 }
 0x221   : > { %713 = vmatmul.mubr.msk.bf16.gmra.mrb[4].mxu1 %vm306_vm0, %v444_v32 }
 0x2ec   : > { %v710_v34 = vpop.f32.mrb[0].mxu1 }
 0x2ed   : > { %539 = vst.msk [vmem:[%s218_s18 + $0x10] sm:$0xff] %vm306_vm0, %v710_v34  ;;  %v506_v35 = vpop.f32.mrb[1].mxu1 }
 0x2ee   : > { %537 = vst.msk [vmem:[%s218_s18] sm:$0xff] %vm306_vm0, %v506_v35  ;;  %v711_v36 = vpop.f32.mrb[2].mxu1 }
 0x2ef   : > { %540 = vst.msk [vmem:[%s218_s18 + $0x18] sm:$0xff] %vm306_vm0, %v711_v36  ;;  %v509_v37 = vpop.f32.mrb[3].mxu1 }
 0x2f0   : > { %538 = vst.msk [vmem:[%s218_s18 + $0x8] sm:$0xff] %vm306_vm0, %v509_v37 }
 0x2f4   : > { %v714_v38 = vpop.f32.mrb[4].mxu1 }
 0x2f5   : > { %543 = vst.msk [vmem:[%s218_s18 + $0x30] sm:$0xff] %vm306_vm0, %v714_v38  ;;  %v522_v39 = vpop.f32.mrb[5].mxu1 }
 0x2f6   : > { %541 = vst.msk [vmem:[%s218_s18 + $0x20] sm:$0xff] %vm306_vm0, %v522_v39  ;;  %v715_v40 = vpop.f32.mrb[6].mxu1 }
 0x2f7   : > { %544 = vst.msk [vmem:[%s218_s18 + $0x38] sm:$0xff] %vm306_vm0, %v715_v40  ;;  %v525_v41 = vpop.f32.mrb[7].mxu1 }
 0x2f8   : > { %542 = vst.msk [vmem:[%s218_s18 + $0x28] sm:$0xff] %vm306_vm0, %v525_v41 }
 0x2f9   : > { %891 = shalt.err (!%p888_p2)
}
 0x2fa   : > { %s892_s25 = scalar_lea.hbm %s1187_s27, 1024  ;;  %s896_s21 = scalar_lea.hbm %s1237_s3, 2048 }
 0x2fb   : > { %p893_p13 = scmp.ne.s32.totalorder %s1187_s27, %s892_s25  ;;  %p897_p4 = scmp.lt.u32.totalorder %s1187_s27, %s1237_s3 }
 0x2fc   : > { %p898_p5 = scmp.lt.u32.totalorder %s896_s21, %s892_s25  ;;  %p900_p11 = scmp.lt.u32.totalorder %s892_s25, %s1187_s27 }
 0x2fd   : > { %p894_p6 = pnand %p893_p13, %p1251_p0 }
 0x2fe   : > { %p899_p8 = por %p898_p5, %p897_p4 }
 0x2ff   : > { %p895_p10 = pneg %p894_p6 }
 0x300   : > { %p901_p1 = por %p900_p11, %p899_p8 }
 0x302   : > { %p902_p3 = pnand %p901_p1, %p895_p10 }
 0x304   : > { %905 = shalt.err (!%p902_p3)
}
 0x305   : > { %s958_s30 = smov 128   ;;  %s959_s18 = smov 8  }
 0x306   : > { %726 = dma.vmem_to_hbm [thread:$0]  (%p1251_p0), %s1181_s20, 1024, %s1187_s27, %s546_s16, %s958_s30, %s958_s30, %s959_s18  }
 0x307 PF: > { %s575_s17 = sand.u32 1, %s936_s12   ;;  %p1252_p7 = scmp.ne.s32.totalorder %s1242_s19, 0 }
 0x308   : > { %p1253_p9 = scmp.ge.s32.totalorder %s948_s15, 2  ;;  %s576_s24 = scalar_lea.sflag [#allocation4], %s575_s17 }
 0x30a   : > { %p740_p12 = pnand %p1253_p9, %p1252_p7 }
 0x30c   : > { %931 = dma.done.wait (!%p740_p12), %s576_s24, 1024  }
 0x30d   : > { %933 = vsyncadd (!%p740_p12), %s576_s24, 4294966272  ;;  %p17_p2 = scmp.ge.s32.totalorder %s1090_s4, 4   ;;  %s1254_s12 = smov %s940_s13 }
 0x30e   : > { %s1255_s13 = smov %s944_s14  ;;  %s1256_s14 = smov %s1106_s9 }
 0x30f   : > { %s1257_s15 = smov %s1090_s4  ;;  %19 = sbr.rel (!%p17_p2) target bundleno = 6 (0x6), region = 85 }
 0x316   :  { %581 = vsyncpa [#allocation3], 1 }
 0x317   :  { %583 = vsyncpa [#allocation3 + $0x1], 1 }
 0x318   :  { %584 = vsyncpa [#allocation6], 1 }
 0x319   :  { %585 = vsyncpa [#allocation4], 1 }
 0x31a   :  { %587 = vsyncpa [#allocation4 + $0x1], 1 }

</bundles_post_ra>
